<compile_context>
chip_gen: v5e
topology: v5e:2x2
jax: 0.10.0
libtpu: 0.0.40
codegen_flags: <defaults>
</compile_context>

<pallas_src>
import jax
import jax.numpy as jnp
from jax.experimental import pallas as pl
from jax.experimental.pallas import tpu as pltpu


def mlp_kernel(xa_ref, w1a_ref, w2a_ref, w3a_ref, o_ref):
    # xa: (8, TB) -- rows 0..3 = features, row 4 == 1 (bias carrier), 5..7 == 0.
    xa = xa_ref[...]

    # Layer 1 (4 -> 64) + bias on the MXU (K padded to 8, bias via ones row).
    # Row 64 of the result re-emits the carried 1 so ReLU keeps it for layer 2.
    h1 = jnp.dot(w1a_ref[...], xa, preferred_element_type=jnp.float32)   # (72, TB)
    h1 = jnp.maximum(h1, 0.0)

    # Layer 2 (64 -> 32) + bias on the MXU.  Row 32 carries the 1 for layer 3.
    h2 = jnp.dot(w2a_ref[...], h1, preferred_element_type=jnp.float32)   # (40, TB)
    h2 = jnp.maximum(h2, 0.0)

    # Layer 3 (32 -> 1) + bias on the MXU.  Only row 0 is meaningful.
    h3 = jnp.dot(w3a_ref[...], h2, preferred_element_type=jnp.float32)   # (8, TB)

    # Lane-dense store (batch on the 128-lane axis).
    o_ref[...] = h3[0:1, :].astype(o_ref.dtype)


def _pick_tile(batch, tb):
    """Clamp the batch tile: 128-aligned, no larger than the padded batch, and
    split so v7x's 2 TensorCores each get work when the batch allows it."""
    b128 = pl.cdiv(batch, 128) * 128
    tb = max(128, min(tb, b128))
    tb = (tb // 128) * 128
    if pl.cdiv(b128, tb) < 2 and b128 >= 256:
        tb = pl.cdiv(pl.cdiv(b128, 2), 128) * 128
    return tb


def iris_mlp(x, w1, b1, w2, b2, w3, b3, *, tb=16384):
    """Forward pass of the IrisDataa MLP.  x: (B, 4) -> (B, 1) float32.

    If x is bfloat16, layer 1 runs as a native bf16 MXU matmul (w1/b1 are cast
    once here, halving the dominant HBM input stream); layers 2/3 stay f32.
    """
    B = x.shape[0]
    assert x.shape == (B, 4)
    tb = _pick_tile(B, tb)
    n_tiles = pl.cdiv(B, tb)
    b_pad = n_tiles * tb

    # Augmented, transposed input: (8, b_pad), batch on lanes.  Built as one
    # fused XLA pass (pad + transpose + cast + ones row).  A producer that
    # already emits this layout avoids this extra HBM pass entirely.
    xa = jnp.zeros((8, b_pad), x.dtype)
    xa = xa.at[0:4, 0:B].set(x.T)
    xa = xa.at[4, :].set(jnp.ones((), x.dtype))

    # Augmented weights: bias folded in as an extra column; one extra row
    # carries the constant 1 through ReLU (ReLU(1) == 1) to feed the next bias.
    w1a = jnp.zeros((72, 8), jnp.float32)
    w1a = w1a.at[0:64, 0:4].set(w1.T)
    w1a = w1a.at[0:64, 4].set(b1.reshape(64))
    w1a = w1a.at[64, 4].set(1.0)
    w1a = w1a.astype(x.dtype)            # bf16 layer-1 weights iff x is bf16

    w2a = jnp.zeros((40, 72), jnp.float32)
    w2a = w2a.at[0:32, 0:64].set(w2.T)
    w2a = w2a.at[0:32, 64].set(b2.reshape(32))
    w2a = w2a.at[32, 64].set(1.0)

    w3a = jnp.zeros((8, 40), jnp.float32)
    w3a = w3a.at[0, 0:32].set(w3.reshape(32))
    w3a = w3a.at[0, 32].set(b3.reshape(()))

    out = pl.pallas_call(
        mlp_kernel,
        out_shape=jax.ShapeDtypeStruct((1, b_pad), jnp.float32),
        grid_spec=pltpu.PrefetchScalarGridSpec(
            num_scalar_prefetch=0,
            grid=(n_tiles,),
            in_specs=[
                pl.BlockSpec((8, tb), lambda i: (0, i)),     # xa tile (pipelined)
                pl.BlockSpec((72, 8), lambda i: (0, 0)),     # W1a (VMEM-resident)
                pl.BlockSpec((40, 72), lambda i: (0, 0)),    # W2a (VMEM-resident)
                pl.BlockSpec((8, 40), lambda i: (0, 0)),     # W3a (VMEM-resident)
            ],
            out_specs=pl.BlockSpec((1, tb), lambda i: (0, i)),
        ),
        compiler_params=pltpu.CompilerParams(
            dimension_semantics=("parallel",),
            # ~9 MiB of VMEM per step at tb=16384 fits every generation's
            # default scoped limit; set vmem_limit_bytes here if raising tb.
        ),
    )(xa, w1a, w2a, w3a)

    return out[0, :B].reshape(B, 1)


def init_params(key):
    # Deterministic init mimicking nn.Linear's uniform(-1/sqrt(fan_in), +).
    ks = jax.random.split(key, 6)

    def linear(kw, kb, fan_in, fan_out):
        bound = 1.0 / jnp.sqrt(float(fan_in))
        w = jax.random.uniform(kw, (fan_in, fan_out), jnp.float32, -bound, bound)
        b = jax.random.uniform(kb, (1, fan_out), jnp.float32, -bound, bound)
        return w, b

    w1, b1 = linear(ks[0], ks[1], 4, 64)
    w2, b2 = linear(ks[2], ks[3], 64, 32)
    w3, b3 = linear(ks[4], ks[5], 32, 1)
    return w1, b1, w2, b2, w3, b3


def ref_forward(x, w1, b1, w2, b2, w3, b3):
    h = jnp.maximum(x @ w1 + b1, 0.0)
    h = jnp.maximum(h @ w2 + b2, 0.0)
    return h @ w3 + b3


if __name__ == "__main__":
    key = jax.random.PRNGKey(0)
    k_x, k_p = jax.random.split(key)

    B = 8  # small batch of iris-like feature vectors, 4 features each
    x = jax.random.normal(k_x, (B, 4), jnp.float32)
    params = init_params(k_p)

    # f32 path: tight check against the pure-JAX reference.
    out = iris_mlp(x, *params)
    jax.block_until_ready(out)
    ref = ref_forward(x, *params)
    assert out.shape == (B, 1)
    assert jnp.allclose(out, ref, atol=1e-4, rtol=1e-4), float(
        jnp.max(jnp.abs(out - ref)))

    # bf16 input path (halved HBM input stream; layer 1 as a native bf16 MXU
    # matmul).  Compared against a reference fed the same bf16-rounded inputs.
    w1, b1, w2, b2, w3, b3 = params
    x_bf = x.astype(jnp.bfloat16)
    out_bf = iris_mlp(x_bf, *params)
    jax.block_until_ready(out_bf)
    ref_bf = ref_forward(
        x_bf.astype(jnp.float32),
        w1.astype(jnp.bfloat16).astype(jnp.float32),
        b1.astype(jnp.bfloat16).astype(jnp.float32),
        w2, b2, w3, b3)
    assert out_bf.shape == (B, 1)
    assert jnp.allclose(out_bf, ref_bf, atol=1e-3, rtol=1e-3), float(
        jnp.max(jnp.abs(out_bf - ref_bf)))

    print("KERNEL_OK")
</pallas_src>

<mosaic_0001>
module attributes {stable_mosaic.version = 11 : i64} {
  func.func @mlp_kernel(%arg0: i32, %arg1: memref<8x128xf32, #tpu.memory_space<vmem>>, %arg2: memref<72x8xf32, #tpu.memory_space<vmem>>, %arg3: memref<40x72xf32, #tpu.memory_space<vmem>>, %arg4: memref<8x40xf32, #tpu.memory_space<vmem>>, %arg5: memref<1x128xf32, #tpu.memory_space<vmem>>) attributes {dimension_semantics = [#tpu.dimension_semantics<parallel>], iteration_bounds = array<i64: 1>, scalar_prefetch = 0 : i64, scratch_operands = 0 : i64, tpu.core_type = #tpu.core_type<tc>, window_params = [{transform_indices = @transform_0, window_bounds = array<i64: 8, 128>}, {pipeline_mode = #tpu.pipeline_mode<synchronous>, transform_indices = @transform_1, window_bounds = array<i64: 72, 8>}, {pipeline_mode = #tpu.pipeline_mode<synchronous>, transform_indices = @transform_2, window_bounds = array<i64: 40, 72>}, {pipeline_mode = #tpu.pipeline_mode<synchronous>, transform_indices = @transform_3, window_bounds = array<i64: 8, 40>}, {transform_indices = @transform_4, window_bounds = array<i64: 1, 128>}]} {
    %c0 = arith.constant 0 : index
    %c0_0 = arith.constant 0 : index
    %0 = vector.load %arg1[%c0, %c0_0] : memref<8x128xf32, #tpu.memory_space<vmem>>, vector<8x128xf32>
    %c0_1 = arith.constant 0 : index
    %c0_2 = arith.constant 0 : index
    %1 = vector.load %arg2[%c0_1, %c0_2] : memref<72x8xf32, #tpu.memory_space<vmem>>, vector<72x8xf32>
    %cst = arith.constant dense<0.000000e+00> : vector<72x128xf32>
    %2 = tpu.matmul %1, %0, %cst {dimension_numbers = #tpu.dot_dimension_numbers<[1], [0], [0], [1], [0, 0, 1, 1], [], []>} : vector<72x8xf32>, vector<8x128xf32>, vector<72x128xf32> -> vector<72x128xf32>
    %cst_3 = arith.constant 0.000000e+00 : f32
    %3 = vector.broadcast %cst_3 : f32 to vector<72x128xf32>
    %4 = arith.maximumf %2, %3 : vector<72x128xf32>
    %c0_4 = arith.constant 0 : index
    %c0_5 = arith.constant 0 : index
    %5 = vector.load %arg3[%c0_4, %c0_5] : memref<40x72xf32, #tpu.memory_space<vmem>>, vector<40x72xf32>
    %cst_6 = arith.constant dense<0.000000e+00> : vector<40x128xf32>
    %6 = tpu.matmul %5, %4, %cst_6 {dimension_numbers = #tpu.dot_dimension_numbers<[1], [0], [0], [1], [0, 0, 1, 1], [], []>} : vector<40x72xf32>, vector<72x128xf32>, vector<40x128xf32> -> vector<40x128xf32>
    %cst_7 = arith.constant 0.000000e+00 : f32
    %7 = vector.broadcast %cst_7 : f32 to vector<40x128xf32>
    %8 = arith.maximumf %6, %7 : vector<40x128xf32>
    %c0_8 = arith.constant 0 : index
    %c0_9 = arith.constant 0 : index
    %9 = vector.load %arg4[%c0_8, %c0_9] : memref<8x40xf32, #tpu.memory_space<vmem>>, vector<8x40xf32>
    %cst_10 = arith.constant dense<0.000000e+00> : vector<8x128xf32>
    %10 = tpu.matmul %9, %8, %cst_10 {dimension_numbers = #tpu.dot_dimension_numbers<[1], [0], [0], [1], [0, 0, 1, 1], [], []>} : vector<8x40xf32>, vector<40x128xf32>, vector<8x128xf32> -> vector<8x128xf32>
    %11 = vector.extract_strided_slice %10 {offsets = [0, 0], sizes = [1, 128], strides = [1, 1]} : vector<8x128xf32> to vector<1x128xf32>
    %c0_11 = arith.constant 0 : index
    %c0_12 = arith.constant 0 : index
    %12 = vector.load %arg5[%c0_11, %c0_12] : memref<1x128xf32, #tpu.memory_space<vmem>>, vector<1x128xf32>
    tpu.vector_store %arg5[%c0_11, %c0_12], %11 {strides = array<i32>} : memref<1x128xf32, #tpu.memory_space<vmem>>, vector<1x128xf32>,
    return
  }
  func.func @transform_0(%arg0: i32) -> (i32, i32) {
    %c0_i32 = arith.constant 0 : i32
    %c0_i32_0 = arith.constant 0 : i32
    return %c0_i32, %arg0 : i32, i32
  }
  func.func @transform_1(%arg0: i32) -> (i32, i32) {
    %c0_i32 = arith.constant 0 : i32
    %c0_i32_0 = arith.constant 0 : i32
    %c0_i32_1 = arith.constant 0 : i32
    return %c0_i32, %c0_i32_0 : i32, i32
  }
  func.func @transform_2(%arg0: i32) -> (i32, i32) {
    %c0_i32 = arith.constant 0 : i32
    %c0_i32_0 = arith.constant 0 : i32
    %c0_i32_1 = arith.constant 0 : i32
    return %c0_i32, %c0_i32_0 : i32, i32
  }
  func.func @transform_3(%arg0: i32) -> (i32, i32) {
    %c0_i32 = arith.constant 0 : i32
    %c0_i32_0 = arith.constant 0 : i32
    %c0_i32_1 = arith.constant 0 : i32
    return %c0_i32, %c0_i32_0 : i32, i32
  }
  func.func @transform_4(%arg0: i32) -> (i32, i32) {
    %c0_i32 = arith.constant 0 : i32
    %c0_i32_0 = arith.constant 0 : i32
    return %c0_i32, %arg0 : i32, i32
  }
}

</mosaic_0001>

<bundles_post_ra>
// kernel: tpu_custom_call.1
= control target key start
LH: loop header
LB: loop body
LE: loop exit
PB: predicated region body
PF: predicated region fallthrough
CT: control target
= control target key end

     0   :  { %vm28_vm0 = vcmask 64512   ;;  %s347_s0 = inlined_call_operand.vmem [shape: f32[8,128], index: 0, kind: input, shape index: {}]   ;;  %s348_s1 = inlined_call_operand.vmem [shape: f32[72,8], index: 1, kind: input, shape index: {}]   ;;  %s349_s2 = inlined_call_operand.vmem [shape: f32[40,72], index: 2, kind: input, shape index: {}]   ;;  %s350_s3 = inlined_call_operand.vmem [shape: f32[8,40], index: 3, kind: input, shape index: {}]   ;;  %s351_s4 = inlined_call_operand.hbm [shape: f32[1,128], index: 4, kind: output, shape index: {}]  }
   0x1   :  { %v18_v0 = vld [vmem:[%s347_s0] sm:$0xff]  ;;  %v24_v1 = vld [vmem:[%s348_s1 + $0x28] sm:$0xff] }
   0x2   :  { %v19_v2 = vld [vmem:[%s348_s1] sm:$0xff]  ;;  %224 = vmatpush.msra.mxu3 %v18_v0  ;;  %71 = vmatpush.msra.mxu0 %v18_v0 }
   0x3   :  { %214 = vmatmul.msk.f32.vlgmr.msra.gmra.mxu3 %vm28_vm0, %v24_v1  ;;  %209 = vmatmul.msk.f32.vlgmr.msra.gmra.mxu0 %vm28_vm0, %v19_v2 }
   0x4   :  { %9 = vsyncpa [#allocation3], 0  ;;  %v25_v3 = vld [vmem:[%s348_s1 + $0x30] sm:$0xff]  ;;  %v20_v4 = vld [vmem:[%s348_s1 + $0x8] sm:$0xff]  ;;  %vm114_vm1 = vcmask 588800   ;;  %vm168_vm2 = vcmask 326656  }
   0x5   :  { %v26_v5 = vld [vmem:[%s348_s1 + $0x38] sm:$0xff]  ;;  %v21_v6 = vld [vmem:[%s348_s1 + $0x10] sm:$0xff]  ;;  %v27_v7 = vld [vmem:[%s348_s1 + $0x40] sm:$0xff]  ;;  %s200_s22 = sshll.u32 %s351_s4, 4  ;;  %s201_s22 = int_to_ptr.hbm [resolvable:$true] %s200_s22 }
   0x6   :  { %v22_v8 = vld [vmem:[%s348_s1 + $0x18] sm:$0xff]  ;;  %v23_v9 = vld [vmem:[%s348_s1 + $0x20] sm:$0xff]  ;;  %v110_v31 = vld [vmem:[%s349_s2 + $0x8] sm:$0xff] }
   0x7   :  { %v112_v28 = vld [vmem:[%s349_s2 + $0x18] sm:$0xff]  ;;  %v109_v29 = vld [vmem:[%s349_s2] sm:$0xff]  ;;  %v111_v32 = vld [vmem:[%s349_s2 + $0x10] sm:$0xff] }
   0x8   :  { %v113_v30 = vld [vmem:[%s349_s2 + $0x20] sm:$0xff]  ;;  %s261_s2 = smov [#allocation2]  }
   0x9   :  { %v167_v43 = vld [vmem:[%s350_s3] sm:$0xff]  ;;  %s198_s19 = sshll.u32 %s261_s2, 4  ;;  %s199_s19 = int_to_ptr.vmem [resolvable:$true] %s198_s19 }
   0xb   :  { %215 = vmatmul.msk.f32.gmra.mxu3 %vm28_vm0, %v25_v3  ;;  %210 = vmatmul.msk.f32.gmra.mxu0 %vm28_vm0, %v20_v4 }
  0x13   :  { %216 = vmatmul.msk.f32.gmra.mxu3 %vm28_vm0, %v26_v5  ;;  %211 = vmatmul.msk.f32.gmra.mxu0 %vm28_vm0, %v21_v6 }
  0x1b   :  { %217 = vmatmul.msk.f32.gmra.mxu3 %vm28_vm0, %v27_v7  ;;  %212 = vmatmul.msk.f32.gmra.mxu0 %vm28_vm0, %v22_v8 }
  0x23   :  { %213 = vmatmul.msk.f32.gmra.mxu0 %vm28_vm0, %v23_v9 }
  0x80   :  { %v73_v10 = vpop.f32.mrf.mxu0 }
  0x81   :  { %v100_v27 = vmax.f32 %v73_v10, 0.0 }
  0x86   :  { %v88_v11 = vpop.f32.mrf.mxu3 }
  0x87   :  { %v105_v22 = vmax.f32 %v88_v11, 0.0 }
  0x88   :  { %v76_v12 = vpop.f32.mrf.mxu0 }
  0x89   :  { %v101_v26 = vmax.f32 %v76_v12, 0.0 }
  0x8e   :  { %v91_v13 = vpop.f32.mrf.mxu3 }
  0x8f   :  { %v106_v21 = vmax.f32 %v91_v13, 0.0 }
  0x90   :  { %v79_v14 = vpop.f32.mrf.mxu0 }
  0x91   :  { %v102_v25 = vmax.f32 %v79_v14, 0.0 }
  0x96   :  { %v94_v15 = vpop.f32.mrf.mxu3 }
  0x97   :  { %v107_v19 = vmax.f32 %v94_v15, 0.0 }
  0x98   :  { %v82_v16 = vpop.f32.mrf.mxu0 }
  0x99   :  { %v103_v24 = vmax.f32 %v82_v16, 0.0 }
  0x9e   :  { %v97_v17 = vpop.f32.mrf.mxu3 }
  0x9f   :  { %v108_v18 = vmax.f32 %v97_v17, 0.0 }
  0xa0   :  { %v85_v20 = vpop.f32.mrf.mxu0 }
  0xa1   :  { %137 = vmatpush.msra.mxu1 %v108_v18  ;;  %225 = vmatpush.msra.mxu2 %v108_v18  ;;  %v104_v23 = vmax.f32 %v85_v20, 0.0 }
  0xa3   :  { %138 = vmatpush.msra.mxu1 %v107_v19  ;;  %226 = vmatpush.msra.mxu2 %v107_v19 }
  0xa5   :  { %139 = vmatpush.msra.mxu1 %v106_v21  ;;  %227 = vmatpush.msra.mxu2 %v106_v21 }
  0xa7   :  { %140 = vmatpush.msra.mxu1 %v105_v22  ;;  %228 = vmatpush.msra.mxu2 %v105_v22 }
  0xa9   :  { %141 = vmatpush.msra.mxu1 %v104_v23  ;;  %229 = vmatpush.msra.mxu2 %v104_v23 }
  0xab   :  { %142 = vmatpush.msra.mxu1 %v103_v24  ;;  %230 = vmatpush.msra.mxu2 %v103_v24 }
  0xad   :  { %143 = vmatpush.msra.mxu1 %v102_v25  ;;  %231 = vmatpush.msra.mxu2 %v102_v25 }
  0xaf   :  { %144 = vmatpush.msra.mxu1 %v101_v26  ;;  %232 = vmatpush.msra.mxu2 %v101_v26 }
  0xb1   :  { %145 = vmatpush.msra.mxu1 %v100_v27  ;;  %233 = vmatpush.msra.mxu2 %v100_v27 }
  0xb2   :  { %221 = vmatmul.msk.f32.vlgmr.msra.gmra.mxu2 %vm114_vm1, %v112_v28  ;;  %218 = vmatmul.msk.f32.vlgmr.msra.gmra.mxu1 %vm114_vm1, %v109_v29 }
  0xba   :  { %222 = vmatmul.msk.f32.gmra.mxu2 %vm114_vm1, %v113_v30  ;;  %219 = vmatmul.msk.f32.gmra.mxu1 %vm114_vm1, %v110_v31 }
  0xc2   :  { %220 = vmatmul.msk.f32.gmra.mxu1 %vm114_vm1, %v111_v32 }
 0x12f   :  { %v147_v33 = vpop.f32.mrf.mxu1 }
 0x130   :  { %v162_v42 = vmax.f32 %v147_v33, 0.0 }
 0x135   :  { %v156_v34 = vpop.f32.mrf.mxu2 }
 0x136   :  { %v165_v39 = vmax.f32 %v156_v34, 0.0 }
 0x137   :  { %v150_v35 = vpop.f32.mrf.mxu1 }
 0x138   :  { %v163_v41 = vmax.f32 %v150_v35, 0.0 }
 0x13d   :  { %v159_v36 = vpop.f32.mrf.mxu2 }
 0x13e   :  { %v166_v37 = vmax.f32 %v159_v36, 0.0 }
 0x13f   :  { %v153_v38 = vpop.f32.mrf.mxu1 }
 0x140   :  { %183 = vmatpush.msrb.mxu2 %v166_v37  ;;  %v164_v40 = vmax.f32 %v153_v38, 0.0 }
 0x142   :  { %184 = vmatpush.msrb.mxu2 %v165_v39 }
 0x144   :  { %185 = vmatpush.msrb.mxu2 %v164_v40 }
 0x146   :  { %186 = vmatpush.msrb.mxu2 %v163_v41 }
 0x148   :  { %187 = vmatpush.msrb.mxu2 %v162_v42 }
 0x149   :  { %223 = vmatmul.msk.f32.vlgmr.msrb.gmra.mxu2 %vm168_vm2, %v167_v43 }
 0x1cc   :  { %v189_v44 = vpop.f32.mrf.mxu2 }
 0x1cd   :  { %192 = vst [vmem:[#allocation2] sm:$0x1] %v189_v44 }
 0x1ce   :  { %203 = dma.vmem_to_hbm [thread:$0]  %s199_s19, 16, %s201_s22, [#allocation3]  }
 0x1cf   :  { %259 = dma.done.wait [#allocation3], 16  }
 0x1d0   :  { %260 = vsyncadd [#allocation3], 4294967280 }
 0x1d1   :  { %208 = vsyncpa [#allocation3], 1 }

</bundles_post_ra>
